<compile_context>
chip_gen: v5e
topology: v5e:2x2
jax: 0.10.0
libtpu: 0.0.40
codegen_flags: <defaults>
</compile_context>

<pallas_src>
import functools

import jax
import jax.numpy as jnp
import numpy as np
from jax.experimental import pallas as pl
from jax.experimental.pallas import tpu as pltpu

IN_FEATURES = 28 * 28   # 784
HIDDEN = 10 * 10        # 100
OUT = 10
HIDDEN_PAD = 128        # lane-aligned hidden width
OUT_PAD = 128           # lane-dense output slab (unmasked vst)


def _round_up(n, m):
    return ((n + m - 1) // m) * m


def _sigmoid(v):
    # exp -> EUP; approximate reciprocal -> EUP vrcp slot (frees the VALU slot).
    return pl.reciprocal(1.0 + jnp.exp(-v), approx=True)


def muhnet_kernel(x_ref, w1_ref, b1_ref, w2_ref, b2_ref, o_ref):
    # sigmoid1 in f32 on the streamed f32 tile; bf16 only for the MXU operands.
    xs = _sigmoid(x_ref[...]).astype(jnp.bfloat16)
    # linear1 (MXU bf16 in / f32 acc) + bias + ReLU
    h = jnp.dot(xs, w1_ref[...], preferred_element_type=jnp.float32) + b1_ref[...]
    h = jnp.maximum(h, 0.0).astype(jnp.bfloat16)
    # linear2 (MXU) + bias + sigmoid2; lane-dense bf16 store
    y = jnp.dot(h, w2_ref[...], preferred_element_type=jnp.float32) + b2_ref[...]
    o_ref[...] = _sigmoid(y).astype(o_ref.dtype)


def prepare_params(w1_t, b1, w2_t, b2):
    """One-time pad + cast of weights/biases (hoisted out of the per-call path).
    w1_t: (784,100), b1: (1,100), w2_t: (100,10), b2: (1,10)."""
    w1p = jnp.pad(w1_t.astype(jnp.bfloat16), ((0, 0), (0, HIDDEN_PAD - HIDDEN)))
    b1p = jnp.pad(b1.astype(jnp.float32), ((0, 0), (0, HIDDEN_PAD - HIDDEN)))
    w2p = jnp.pad(w2_t.astype(jnp.bfloat16),
                  ((0, HIDDEN_PAD - HIDDEN), (0, OUT_PAD - OUT)))
    b2p = jnp.pad(b2.astype(jnp.float32), ((0, 0), (0, OUT_PAD - OUT)))
    return w1p, b1p, w2p, b2p


@functools.partial(jax.jit, static_argnames=("tb",))
def muhnet_forward(x, w1p, b1p, w2p, b2p, *, tb=1024):
    """x: (B, 784) float32 (already flattened). Params from prepare_params().
    Returns (B, 10) float32."""
    B = x.shape[0]

    # Batch tile: multiple of 8 (sublane), capped at 2048, and sized so moderate B
    # still yields grid >= 2 blocks (megacore).  No wrapper-side padding of x: the
    # ragged last block's loads are padded and its stores masked by Pallas.
    TB = max(8, min(tb, 2048, _round_up(pl.cdiv(B, 2), 8)))
    if B < TB:
        TB = B  # block dim == full array dim is always legal
    grid = (pl.cdiv(B, TB),)

    cost = pl.CostEstimate(
        flops=2 * B * (IN_FEATURES * HIDDEN_PAD + HIDDEN_PAD * OUT_PAD),
        transcendentals=2 * B * (IN_FEATURES + OUT_PAD),      # exp + vrcp
        bytes_accessed=(B * IN_FEATURES * 4                    # x (f32, single pass)
                        + IN_FEATURES * HIDDEN_PAD * 2         # w1 (bf16)
                        + HIDDEN_PAD * OUT_PAD * 2             # w2 (bf16)
                        + (HIDDEN_PAD + OUT_PAD) * 4           # biases (f32)
                        + B * OUT_PAD * 2),                    # out (bf16)
    )

    out = pl.pallas_call(
        muhnet_kernel,
        out_shape=jax.ShapeDtypeStruct((B, OUT_PAD), jnp.bfloat16),
        grid=grid,
        in_specs=[
            # x streamed per batch tile (double-buffered by the pipeline), f32.
            pl.BlockSpec((TB, IN_FEATURES), lambda i: (i, 0)),
            # Weights / biases: constant index maps -> VMEM-resident (~230 KB).
            pl.BlockSpec((IN_FEATURES, HIDDEN_PAD), lambda i: (0, 0)),
            pl.BlockSpec((1, HIDDEN_PAD), lambda i: (0, 0)),
            pl.BlockSpec((HIDDEN_PAD, OUT_PAD), lambda i: (0, 0)),
            pl.BlockSpec((1, OUT_PAD), lambda i: (0, 0)),
        ],
        out_specs=pl.BlockSpec((TB, OUT_PAD), lambda i: (i, 0)),
        compiler_params=pltpu.CompilerParams(
            dimension_semantics=("parallel",),   # megacore sharding on v7x
            vmem_limit_bytes=32 << 20,           # honest for TB<=1024 f32 x 2-buffer
        ),
        cost_estimate=cost,
    )(x, w1p, b1p, w2p, b2p)

    # Real 10 columns; upcast of the tiny (B, 10) slice is negligible.
    return out[:, :OUT].astype(jnp.float32)


def init_params():
    """Deterministic init mimicking nn.Linear defaults (uniform +/- 1/sqrt(fan_in))."""
    key = jax.random.PRNGKey(0)
    k1, k2, k3, k4 = jax.random.split(key, 4)
    bound1 = 1.0 / np.sqrt(IN_FEATURES)
    bound2 = 1.0 / np.sqrt(HIDDEN)
    # PyTorch weight is (out, in); store transposed (in, out) so the kernel does x @ W.
    w1_t = jax.random.uniform(k1, (IN_FEATURES, HIDDEN), jnp.float32, -bound1, bound1)
    b1 = jax.random.uniform(k2, (1, HIDDEN), jnp.float32, -bound1, bound1)
    w2_t = jax.random.uniform(k3, (HIDDEN, OUT), jnp.float32, -bound2, bound2)
    b2 = jax.random.uniform(k4, (1, OUT), jnp.float32, -bound2, bound2)
    return w1_t, b1, w2_t, b2


if __name__ == "__main__":
    key = jax.random.PRNGKey(0)
    B = 8
    # Input consistent with a 28x28 single-channel image batch, flattened in-script
    # (= torch.flatten(x, 1)).
    x_img = jax.random.normal(key, (B, 1, 28, 28), jnp.float32)
    x = x_img.reshape(B, -1)

    w1_t, b1, w2_t, b2 = init_params()
    w1p, b1p, w2p, b2p = prepare_params(w1_t, b1, w2_t, b2)

    out = muhnet_forward(x, w1p, b1p, w2p, b2p)
    out = jax.block_until_ready(out)
    assert out.shape == (B, OUT)

    # f32 reference with the same bf16 roundings the kernel applies at the MXU /
    # store boundaries (weights, post-sigmoid and post-ReLU activations).
    xs = jax.nn.sigmoid(x).astype(jnp.bfloat16).astype(jnp.float32)
    w1b = w1_t.astype(jnp.bfloat16).astype(jnp.float32)
    w2b = w2_t.astype(jnp.bfloat16).astype(jnp.float32)
    h_ref = jnp.maximum(xs @ w1b + b1, 0.0).astype(jnp.bfloat16).astype(jnp.float32)
    ref = jax.nn.sigmoid(h_ref @ w2b + b2)
    np.testing.assert_allclose(np.asarray(out), np.asarray(ref), rtol=2e-2, atol=2e-2)

    print("KERNEL_OK")
</pallas_src>

<mosaic_0001>
module attributes {stable_mosaic.version = 11 : i64} {
  func.func @muhnet_kernel(%arg0: i32, %arg1: memref<8x784xf32, #tpu.memory_space<vmem>>, %arg2: memref<784x128xbf16, #tpu.memory_space<vmem>>, %arg3: memref<1x128xf32, #tpu.memory_space<vmem>>, %arg4: memref<128x128xbf16, #tpu.memory_space<vmem>>, %arg5: memref<1x128xf32, #tpu.memory_space<vmem>>, %arg6: memref<8x128xbf16, #tpu.memory_space<vmem>>) attributes {dimension_semantics = [#tpu.dimension_semantics<parallel>], iteration_bounds = array<i64: 1>, scalar_prefetch = 0 : i64, scratch_operands = 0 : i64, tpu.core_type = #tpu.core_type<tc>, window_params = [{transform_indices = @transform_0, window_bounds = array<i64: 8, 784>}, {pipeline_mode = #tpu.pipeline_mode<synchronous>, transform_indices = @transform_1, window_bounds = array<i64: 784, 128>}, {pipeline_mode = #tpu.pipeline_mode<synchronous>, transform_indices = @transform_2, window_bounds = array<i64: 1, 128>}, {pipeline_mode = #tpu.pipeline_mode<synchronous>, transform_indices = @transform_3, window_bounds = array<i64: 128, 128>}, {pipeline_mode = #tpu.pipeline_mode<synchronous>, transform_indices = @transform_4, window_bounds = array<i64: 1, 128>}, {transform_indices = @transform_5, window_bounds = array<i64: 8, 128>}]} {
    %c0 = arith.constant 0 : index
    %c0_0 = arith.constant 0 : index
    %0 = vector.load %arg1[%c0, %c0_0] : memref<8x784xf32, #tpu.memory_space<vmem>>, vector<8x784xf32>
    %cst = arith.constant 0.000000e+00 : f32
    %1 = vector.broadcast %cst : f32 to vector<8x784xf32>
    %2 = arith.subf %1, %0 : vector<8x784xf32>
    %3 = math.exp %2 : vector<8x784xf32>
    %cst_1 = arith.constant 1.000000e+00 : f32
    %4 = vector.broadcast %cst_1 : f32 to vector<8x784xf32>
    %5 = arith.addf %4, %3 : vector<8x784xf32>
    %6 = tpu.reciprocal %5 {approx = true} : vector<8x784xf32> -> vector<8x784xf32>
    %7 = arith.truncf %6 : vector<8x784xf32> to vector<8x784xbf16>
    %c0_2 = arith.constant 0 : index
    %c0_3 = arith.constant 0 : index
    %8 = vector.load %arg2[%c0_2, %c0_3] : memref<784x128xbf16, #tpu.memory_space<vmem>>, vector<784x128xbf16>
    %cst_4 = arith.constant dense<0.000000e+00> : vector<8x128xf32>
    %9 = tpu.matmul %7, %8, %cst_4 {dimension_numbers = #tpu.dot_dimension_numbers<[1], [0], [0], [1], [0, 0, 1, 1], [], []>} : vector<8x784xbf16>, vector<784x128xbf16>, vector<8x128xf32> -> vector<8x128xf32>
    %c0_5 = arith.constant 0 : index
    %c0_6 = arith.constant 0 : index
    %10 = vector.load %arg3[%c0_5, %c0_6] : memref<1x128xf32, #tpu.memory_space<vmem>>, vector<1x128xf32>
    %11 = vector.broadcast %10 : vector<1x128xf32> to vector<8x128xf32>
    %12 = arith.addf %9, %11 : vector<8x128xf32>
    %cst_7 = arith.constant 0.000000e+00 : f32
    %13 = vector.broadcast %cst_7 : f32 to vector<8x128xf32>
    %14 = arith.maximumf %12, %13 : vector<8x128xf32>
    %15 = arith.truncf %14 : vector<8x128xf32> to vector<8x128xbf16>
    %c0_8 = arith.constant 0 : index
    %c0_9 = arith.constant 0 : index
    %16 = vector.load %arg4[%c0_8, %c0_9] : memref<128x128xbf16, #tpu.memory_space<vmem>>, vector<128x128xbf16>
    %cst_10 = arith.constant dense<0.000000e+00> : vector<8x128xf32>
    %17 = tpu.matmul %15, %16, %cst_10 {dimension_numbers = #tpu.dot_dimension_numbers<[1], [0], [0], [1], [0, 0, 1, 1], [], []>} : vector<8x128xbf16>, vector<128x128xbf16>, vector<8x128xf32> -> vector<8x128xf32>
    %c0_11 = arith.constant 0 : index
    %c0_12 = arith.constant 0 : index
    %18 = vector.load %arg5[%c0_11, %c0_12] : memref<1x128xf32, #tpu.memory_space<vmem>>, vector<1x128xf32>
    %19 = vector.broadcast %18 : vector<1x128xf32> to vector<8x128xf32>
    %20 = arith.addf %17, %19 : vector<8x128xf32>
    %cst_13 = arith.constant 0.000000e+00 : f32
    %21 = vector.broadcast %cst_13 : f32 to vector<8x128xf32>
    %22 = arith.subf %21, %20 : vector<8x128xf32>
    %23 = math.exp %22 : vector<8x128xf32>
    %cst_14 = arith.constant 1.000000e+00 : f32
    %24 = vector.broadcast %cst_14 : f32 to vector<8x128xf32>
    %25 = arith.addf %24, %23 : vector<8x128xf32>
    %26 = tpu.reciprocal %25 {approx = true} : vector<8x128xf32> -> vector<8x128xf32>
    %27 = arith.truncf %26 : vector<8x128xf32> to vector<8x128xbf16>
    %c0_15 = arith.constant 0 : index
    %c0_16 = arith.constant 0 : index
    %28 = vector.load %arg6[%c0_15, %c0_16] : memref<8x128xbf16, #tpu.memory_space<vmem>>, vector<8x128xbf16>
    tpu.vector_store %arg6[%c0_15, %c0_16], %27 {strides = array<i32>} : memref<8x128xbf16, #tpu.memory_space<vmem>>, vector<8x128xbf16>,
    return
  }
  func.func @transform_0(%arg0: i32) -> (i32, i32) {
    %c0_i32 = arith.constant 0 : i32
    %c0_i32_0 = arith.constant 0 : i32
    return %arg0, %c0_i32 : i32, i32
  }
  func.func @transform_1(%arg0: i32) -> (i32, i32) {
    %c0_i32 = arith.constant 0 : i32
    %c0_i32_0 = arith.constant 0 : i32
    %c0_i32_1 = arith.constant 0 : i32
    return %c0_i32, %c0_i32_0 : i32, i32
  }
  func.func @transform_2(%arg0: i32) -> (i32, i32) {
    %c0_i32 = arith.constant 0 : i32
    %c0_i32_0 = arith.constant 0 : i32
    %c0_i32_1 = arith.constant 0 : i32
    return %c0_i32, %c0_i32_0 : i32, i32
  }
  func.func @transform_3(%arg0: i32) -> (i32, i32) {
    %c0_i32 = arith.constant 0 : i32
    %c0_i32_0 = arith.constant 0 : i32
    %c0_i32_1 = arith.constant 0 : i32
    return %c0_i32, %c0_i32_0 : i32, i32
  }
  func.func @transform_4(%arg0: i32) -> (i32, i32) {
    %c0_i32 = arith.constant 0 : i32
    %c0_i32_0 = arith.constant 0 : i32
    %c0_i32_1 = arith.constant 0 : i32
    return %c0_i32, %c0_i32_0 : i32, i32
  }
  func.func @transform_5(%arg0: i32) -> (i32, i32) {
    %c0_i32 = arith.constant 0 : i32
    %c0_i32_0 = arith.constant 0 : i32
    return %arg0, %c0_i32 : i32, i32
  }
}

</mosaic_0001>

<bundles_post_ra>
// kernel: muhnet_forward.1
= control target key start
LH: loop header
LB: loop body
LE: loop exit
PB: predicated region body
PF: predicated region fallthrough
CT: control target
= control target key end

     0   :  { %10 = vsyncpa [#allocation3], 0  ;;  %s1156_s0 = inlined_call_operand.hbm [shape: f32[8,784], index: 0, kind: input, shape index: {}]   ;;  %s1157_s1 = inlined_call_operand.hbm [shape: bf16[784,128], index: 1, kind: input, shape index: {}]   ;;  %s1158_s2 = inlined_call_operand.vmem [shape: f32[1,128], index: 2, kind: input, shape index: {}]   ;;  %s1159_s3 = inlined_call_operand.hbm [shape: bf16[128,128], index: 3, kind: input, shape index: {}]   ;;  %s1160_s4 = inlined_call_operand.vmem [shape: f32[1,128], index: 4, kind: input, shape index: {}]   ;;  %s1161_s5 = inlined_call_operand.vmem [shape: bf16[8,128], index: 5, kind: output, shape index: {}]  }
   0x1   :  { %11 = vsyncpa [#allocation5], 0  ;;  %s27_s20 = sshll.u32 %s1157_s1, 4  ;;  %s1103_s21 = smov [#allocation4]   ;;  %s28_s20 = int_to_ptr.hbm [resolvable:$true] %s27_s20 }
   0x2   :  { %s29_s22 = sshll.u32 %s1103_s21, 4  ;;  %s17_s25 = sshll.u32 %s1156_s0, 4  ;;  %s30_s22 = int_to_ptr.vmem [resolvable:$true] %s29_s22  ;;  %s18_s25 = int_to_ptr.hbm [resolvable:$true] %s17_s25 }
   0x3   :  { %s1104_s26 = smov 64   ;;  %s1105_s27 = smov 4  }
   0x4   :  { %35 = dma.hbm_to_vmem [thread:$0]  %s28_s20, 6272, %s30_s22, [#allocation5], %s1104_s26, %s1104_s26, %s1105_s27  }
   0x5   :  { %s1106_s28 = smov [#allocation2]   ;;  %s42_s7 = sshll.u32 %s1159_s3, 4  ;;  %s43_s7 = int_to_ptr.hbm [resolvable:$true] %s42_s7 }
   0x6   :  { %s19_s29 = sshll.u32 %s1106_s28, 4  ;;  %s1107_s1 = smov [#allocation6]   ;;  %s20_s29 = int_to_ptr.vmem [resolvable:$true] %s19_s29 }
   0x7   :  { %22 = dma.hbm_to_vmem [thread:$0]  %s18_s25, 896, %s20_s29, [#allocation3]  }
   0x8   :  { %s44_s8 = sshll.u32 %s1107_s1, 4  ;;  %s45_s8 = int_to_ptr.vmem [resolvable:$true] %s44_s8 }
   0x9   :  { %50 = dma.hbm_to_vmem [thread:$0]  %s43_s7, 1024, %s45_s8, [#allocation5], %s1104_s26, %s1104_s26, %s1105_s27  }
   0xa   :  { %1099 = dma.done.wait [#allocation3], 896  }
   0xb   :  { %1100 = vsyncadd [#allocation3], 4294966400 }
   0xc   :  { %1101 = dma.done.wait [#allocation5], 7296  }
   0xd   :  { %1102 = vsyncadd [#allocation5], 4294960000  ;;  %v938_v0 = vld [vmem:[#allocation4 + $0x38] sm:$0xff]  ;;  %v937_v3 = vld [vmem:[#allocation4 + $0x30] sm:$0xff]  ;;  %vm511_vm0 = vcmask 130048  }
   0xe   :  { %v946_v1 = vld [vmem:[#allocation4 + $0x78] sm:$0xff]  ;;  %515 = vmatpush.bf16.msra.mxu0 %v938_v0  ;;  %v945_v4 = vld [vmem:[#allocation4 + $0x70] sm:$0xff]  ;;  %v936_v8 = vld [vmem:[#allocation4 + $0x28] sm:$0xff] }
   0xf   :  { %v954_v2 = vld [vmem:[#allocation4 + $0xb8] sm:$0xff]  ;;  %528 = vmatpush.bf16.msra.mxu1 %v946_v1  ;;  %v953_v5 = vld [vmem:[#allocation4 + $0xb0] sm:$0xff]  ;;  %v944_v9 = vld [vmem:[#allocation4 + $0x68] sm:$0xff] }
  0x10   :  { %541 = vmatpush.bf16.msra.mxu2 %v954_v2  ;;  %v962_v6 = vld [vmem:[#allocation4 + $0xf8] sm:$0xff]  ;;  %v961_v7 = vld [vmem:[#allocation4 + $0xf0] sm:$0xff]  ;;  %v952_v10 = vld [vmem:[#allocation4 + $0xa8] sm:$0xff] }
  0x11   :  { %554 = vmatpush.bf16.msra.mxu3 %v962_v6  ;;  %v960_v11 = vld [vmem:[#allocation4 + $0xe8] sm:$0xff]  ;;  %v935_v12 = vld [vmem:[#allocation4 + $0x20] sm:$0xff]  ;;  %v68_v15 = vld [vmem:[#allocation2 + $0x10] sm:$0xff] }
  0x12   :  { %516 = vmatpush.bf16.msra.mxu0 %v937_v3  ;;  %v943_v13 = vld [vmem:[#allocation4 + $0x60] sm:$0xff]  ;;  %v66_v16 = vld [vmem:[#allocation2] sm:$0xff]  ;;  %v75_v17 = vsub.f32 0.0, %v68_v15  ;;  %v934_v19 = vld [vmem:[#allocation4 + $0x18] sm:$0xff] }
  0x13   :  { %529 = vmatpush.bf16.msra.mxu1 %v945_v4  ;;  %v951_v14 = vld [vmem:[#allocation4 + $0xa0] sm:$0xff]  ;;  %v73_v18 = vsub.f32 0.0, %v66_v16  ;;  %v67_v21 = vld [vmem:[#allocation2 + $0x8] sm:$0xff]  ;;  %v942_v22 = vld [vmem:[#allocation4 + $0x58] sm:$0xff] }
  0x14   :  { %542 = vmatpush.bf16.msra.mxu2 %v953_v5  ;;  %v959_v20 = vld [vmem:[#allocation4 + $0xe0] sm:$0xff]  ;;  %v84_v23 = vmul.f32 1.442695, %v75_v17  ;;  %v74_v25 = vsub.f32 0.0, %v67_v21  ;;  %v950_v26 = vld [vmem:[#allocation4 + $0x98] sm:$0xff]  ;;  %v933_v33 = vld [vmem:[#allocation4 + $0x10] sm:$0xff] }
  0x15   :  { %555 = vmatpush.bf16.msra.mxu3 %v961_v7  ;;  %v80_v24 = vmul.f32 1.442695, %v73_v18  ;;  %v69_v27 = vld [vmem:[#allocation2 + $0x18] sm:$0xff]  ;;  %v72_v30 = vld [vmem:[#allocation2 + $0x30] sm:$0xff]  ;;  %v941_v34 = vld [vmem:[#allocation4 + $0x50] sm:$0xff] }
  0x16   :  { %517 = vmatpush.bf16.msra.mxu0 %v936_v8  ;;  %995 = vpow2.f32 %v84_v23  ;;  %v82_v28 = vmul.f32 1.442695, %v74_v25  ;;  %v76_v29 = vsub.f32 0.0, %v69_v27  ;;  %v958_v31 = vld [vmem:[#allocation4 + $0xd8] sm:$0xff]  ;;  %v79_v32 = vsub.f32 0.0, %v72_v30  ;;  %v949_v36 = vld [vmem:[#allocation4 + $0x90] sm:$0xff] }
  0x17   :  { %530 = vmatpush.bf16.msra.mxu1 %v944_v9  ;;  %997 = vpow2.f32 %v80_v24  ;;  %v957_v38 = vld [vmem:[#allocation4 + $0xd0] sm:$0xff]  ;;  %v932_v40 = vld [vmem:[#allocation4 + $0x8] sm:$0xff]  ;;  %v931_v52 = vld [vmem:[#allocation4] sm:$0xff] }
  0x18   :  { %543 = vmatpush.bf16.msra.mxu2 %v952_v10  ;;  %999 = vpow2.f32 %v82_v28  ;;  %v86_v35 = vmul.f32 1.442695, %v76_v29  ;;  %v92_v37 = vmul.f32 1.442695, %v79_v32  ;;  %v940_v41 = vld [vmem:[#allocation4 + $0x48] sm:$0xff]  ;;  %v71_v50 = vld [vmem:[#allocation2 + $0x28] sm:$0xff] }
  0x19   :  { %556 = vmatpush.bf16.msra.mxu3 %v960_v11  ;;  %v948_v43 = vld [vmem:[#allocation4 + $0x88] sm:$0xff]  ;;  %v939_v53 = vld [vmem:[#allocation4 + $0x40] sm:$0xff]  ;;  %v970_v54 = vld [vmem:[#allocation4 + $0x138] sm:$0xff]  ;;  %v78_v59 = vsub.f32 0.0, %v71_v50 }
  0x1a   :  { %518 = vmatpush.bf16.msra.mxu0 %v935_v12  ;;  %1001 = vpow2.f32 %v86_v35  ;;  %v70_v47 = vld [vmem:[#allocation2 + $0x20] sm:$0xff]  ;;  %v978_v55 = vld [vmem:[#allocation4 + $0x178] sm:$0xff]  ;;  %v947_v58 = vld [vmem:[#allocation4 + $0x80] sm:$0xff] }
  0x1b   :  { %531 = vmatpush.bf16.msra.mxu1 %v943_v13  ;;  %1003 = vpow2.f32 %v92_v37  ;;  %v956_v48 = vld [vmem:[#allocation4 + $0xc8] sm:$0xff]  ;;  %v77_v57 = vsub.f32 0.0, %v70_v47  ;;  %v955_v60 = vld [vmem:[#allocation4 + $0xc0] sm:$0xff]  ;;  %v969_v0 = vld [vmem:[#allocation4 + $0x130] sm:$0xff]  ;;  %v90_v5 = vmul.f32 1.442695, %v78_v59 }
  0x1c   :  { %544 = vmatpush.bf16.msra.mxu2 %v951_v14  ;;  %v996_v39 = vpop.eup %995  ;;  %v979_v61 = vld [vmem:[#allocation4 + $0x180] sm:$0xff]  ;;  %v977_v1 = vld [vmem:[#allocation4 + $0x170] sm:$0xff]  ;;  %v968_v10 = vld [vmem:[#allocation4 + $0x128] sm:$0xff] }
  0x1d   :  { %557 = vmatpush.bf16.msra.mxu3 %v959_v20  ;;  %v998_v42 = vpop.eup %997  ;;  %v96_v44 = vadd.f32 1.0, %v996_v39  ;;  %v88_v2 = vmul.f32 1.442695, %v77_v57  ;;  %v976_v11 = vld [vmem:[#allocation4 + $0x168] sm:$0xff]  ;;  %v967_v14 = vld [vmem:[#allocation4 + $0x120] sm:$0xff]  ;;  %v966_v18 = vld [vmem:[#allocation4 + $0x118] sm:$0xff] }
  0x1e   :  { %519 = vmatpush.bf16.msra.mxu0 %v934_v19  ;;  %v1000_v45 = vpop.eup %999  ;;  %v94_v46 = vadd.f32 1.0, %v998_v42  ;;  %v975_v15 = vld [vmem:[#allocation4 + $0x160] sm:$0xff]  ;;  %v974_v19 = vld [vmem:[#allocation4 + $0x158] sm:$0xff]  ;;  %v965_v23 = vld [vmem:[#allocation4 + $0x110] sm:$0xff] }
  0x1f   :  { %532 = vmatpush.bf16.msra.mxu1 %v942_v22  ;;  %1005 = vrcp.f32 %v96_v44  ;;  %v95_v49 = vadd.f32 1.0, %v1000_v45  ;;  %v973_v24 = vld [vmem:[#allocation4 + $0x150] sm:$0xff]  ;;  %v972_v27 = vld [vmem:[#allocation4 + $0x148] sm:$0xff]  ;;  %v963_v30 = vld [vmem:[#allocation4 + $0x100] sm:$0xff] }
  0x20   :  { %545 = vmatpush.bf16.msra.mxu2 %v950_v26  ;;  %v1002_v51 = vpop.eup %1001  ;;  %1007 = vrcp.f32 %v94_v46  ;;  %v964_v26 = vld [vmem:[#allocation4 + $0x108] sm:$0xff]  ;;  %v986_v35 = vld [vmem:[#allocation6 + $0x30] sm:$0xff] }
  0x21   :  { %558 = vmatpush.bf16.msra.mxu3 %v958_v31  ;;  %1009 = vrcp.f32 %v95_v49  ;;  %v97_v56 = vadd.f32 1.0, %v1002_v51  ;;  %v1004_v62 = vpop.eup %1003  ;;  %v971_v31 = vld [vmem:[#allocation4 + $0x140] sm:$0xff]  ;;  %v984_v37 = vld [vmem:[#allocation6 + $0x20] sm:$0xff]  ;;  %v982_v39 = vld [vmem:[#allocation6 + $0x10] sm:$0xff] }
  0x22   :  { %520 = vmatpush.bf16.msra.mxu0 %v933_v33  ;;  %v100_v12 = vadd.f32 1.0, %v1004_v62  ;;  %v980_v42 = vld [vmem:[#allocation6] sm:$0xff] }
  0x23   :  { %533 = vmatpush.bf16.msra.mxu1 %v941_v34  ;;  %1011 = vrcp.f32 %v97_v56  ;;  %v987_v34 = vld [vmem:[#allocation6 + $0x38] sm:$0xff]  ;;  %v993_v47 = vld [vmem:[%s1158_s2] ss:$0 sm:$0xff] }
  0x24   :  { %546 = vmatpush.bf16.msra.mxu2 %v949_v36  ;;  %1013 = vpow2.f32 %v88_v2  ;;  %v985_v36 = vld [vmem:[#allocation6 + $0x28] sm:$0xff]  ;;  %v994_v2 = vld [vmem:[%s1160_s4] ss:$0 sm:$0xff] }
  0x25   :  { %559 = vmatpush.bf16.msra.mxu3 %v957_v38  ;;  %v1006_v63 = vpop.eup %1005  ;;  %1015 = vpow2.f32 %v90_v5  ;;  %v983_v38 = vld [vmem:[#allocation6 + $0x18] sm:$0xff] }
  0x26   :  { %521 = vmatpush.bf16.msra.mxu0 %v932_v40  ;;  %v1008_v3 = vpop.eup %1007  ;;  %v110_v4 = vpack.c.bf16 %v1006_v63, %v1006_v63  ;;  %1017 = vrcp.f32 %v100_v12  ;;  %v981_v40 = vld [vmem:[#allocation6 + $0x8] sm:$0xff] }
  0x27   :  { %534 = vmatpush.bf16.msra.mxu1 %v940_v41  ;;  %v1010_v6 = vpop.eup %1009  ;;  %v108_v7 = vpack.c.bf16 %v1008_v3, %v1008_v3 }
  0x28   :  { %547 = vmatpush.bf16.msra.mxu2 %v948_v43  ;;  %v109_v8 = vpack.c.bf16 %v1010_v6, %v1010_v6 }
  0x29   :  { %560 = vmatpush.bf16.msra.mxu3 %v956_v48  ;;  %v1012_v9 = vpop.eup %1011 }
  0x2a   :  { %522 = vmatpush.bf16.msra.mxu0 %v931_v52  ;;  %v111_v13 = vpack.c.bf16 %v1012_v9, %v1012_v9  ;;  %v1014_v16 = vpop.eup %1013 }
  0x2b   :  { %535 = vmatpush.bf16.msra.mxu1 %v939_v53  ;;  %v1016_v17 = vpop.eup %1015  ;;  %v98_v20 = vadd.f32 1.0, %v1014_v16 }
  0x2c   :  { %548 = vmatpush.bf16.msra.mxu2 %v947_v58  ;;  %v1018_v21 = vpop.eup %1017  ;;  %v99_v22 = vadd.f32 1.0, %v1016_v17 }
  0x2d   :  { %561 = vmatpush.bf16.msra.mxu3 %v955_v60  ;;  %523 = vmatmul.bf16.vlgmr.msra.gmra.mxu0 %v108_v7  ;;  %v114_v25 = vpack.c.bf16 %v1018_v21, %v1018_v21  ;;  %1019 = vrcp.f32 %v98_v20 }
  0x2e   :  { %567 = vmatpush.bf16.msrb.mxu0 %v970_v54  ;;  %536 = vmatmul.bf16.vlgmr.msra.gmra.mxu1 %v109_v8  ;;  %1021 = vrcp.f32 %v99_v22 }
  0x2f   :  { %580 = vmatpush.bf16.msrb.mxu1 %v978_v55  ;;  %549 = vmatmul.bf16.vlgmr.msra.gmra.mxu2 %v110_v4 }
  0x30   :  { %600 = vmatpush.bf16.msrb.mxu2 %v979_v61  ;;  %562 = vmatmul.bf16.vlgmr.msra.gmra.mxu3 %v111_v13 }
  0x31   :  { %676 = vmatpush.bf16.msrb.mxu3 %v987_v34 }
  0x32   :  { %568 = vmatpush.bf16.msrb.mxu0 %v969_v0 }
  0x33   :  { %581 = vmatpush.bf16.msrb.mxu1 %v977_v1  ;;  %v1020_v28 = vpop.eup %1019 }
  0x34   :  { %v1022_v29 = vpop.eup %1021  ;;  %v112_v32 = vpack.c.bf16 %v1020_v28, %v1020_v28 }
  0x35   :  { %v113_v33 = vpack.c.bf16 %v1022_v29, %v1022_v29  ;;  %677 = vmatpush.bf16.msrb.mxu3 %v986_v35 }
  0x36   :  { %569 = vmatpush.bf16.msrb.mxu0 %v968_v10 }
  0x37   :  { %582 = vmatpush.bf16.msrb.mxu1 %v976_v11 }
  0x39   :  { %678 = vmatpush.bf16.msrb.mxu3 %v985_v36 }
  0x3a   :  { %570 = vmatpush.bf16.msrb.mxu0 %v967_v14 }
  0x3b   :  { %583 = vmatpush.bf16.msrb.mxu1 %v975_v15 }
  0x3d   :  { %679 = vmatpush.bf16.msrb.mxu3 %v984_v37 }
  0x3e   :  { %571 = vmatpush.bf16.msrb.mxu0 %v966_v18 }
  0x3f   :  { %584 = vmatpush.bf16.msrb.mxu1 %v974_v19  ;;  %898 = vmatmul.msk.bf16.vlgmr.msrb.gmra.mxu2 %vm511_vm0, %v114_v25 }
  0x41   :  { %680 = vmatpush.bf16.msrb.mxu3 %v983_v38 }
  0x42   :  { %572 = vmatpush.bf16.msrb.mxu0 %v965_v23 }
  0x43   :  { %585 = vmatpush.bf16.msrb.mxu1 %v973_v24 }
  0x45   :  { %681 = vmatpush.bf16.msrb.mxu3 %v982_v39 }
  0x46   :  { %573 = vmatpush.bf16.msrb.mxu0 %v964_v26 }
  0x47   :  { %586 = vmatpush.bf16.msrb.mxu1 %v972_v27 }
  0x49   :  { %682 = vmatpush.bf16.msrb.mxu3 %v981_v40 }
  0x4a   :  { %574 = vmatpush.bf16.msrb.mxu0 %v963_v30 }
  0x4b   :  { %587 = vmatpush.bf16.msrb.mxu1 %v971_v31 }
  0x4d   :  { %575 = vmatmul.bf16.vlgmr.msrb.gmra.mxu0 %v112_v32  ;;  %683 = vmatpush.bf16.msrb.mxu3 %v980_v42 }
  0x4e   :  { %588 = vmatmul.bf16.vlgmr.msrb.gmra.mxu1 %v113_v33 }
  0xaa   :  { %v524_v41 = vpop.f32.mrf.mxu0 }
  0xab   :  { %v537_v43 = vpop.f32.mrf.mxu1  ;;  %v525_v49 = vadd.f32 %v993_v47, %v524_v41 }
  0xad   :  { %v538_v52 = vadd.f32 %v537_v43, %v525_v49 }
  0xb2   :  { %v550_v44 = vpop.f32.mrf.mxu2  ;;  %v526_v45 = vpop.f32.mrf.mxu0 }
  0xb3   :  { %v563_v46 = vpop.f32.mrf.mxu3  ;;  %v539_v48 = vpop.f32.mrf.mxu1  ;;  %v551_v53 = vadd.f32 %v550_v44, %v538_v52 }
  0xb5   :  { %v564_v55 = vadd.f32 %v563_v46, %v551_v53 }
  0xba   :  { %v552_v50 = vpop.f32.mrf.mxu2 }
  0xbb   :  { %v565_v51 = vpop.f32.mrf.mxu3 }
  0xc2   :  { %v602_v54 = vpop.f32.mrf.mxu2 }
  0xca   :  { %v576_v56 = vpop.f32.mrf.mxu0  ;;  %v604_v60 = vpop.f32.mrf.mxu2 }
  0xcb   :  { %v589_v57 = vpop.f32.mrf.mxu1  ;;  %v577_v58 = vadd.f32 %v576_v56, %v564_v55 }
  0xcd   :  { %v590_v59 = vadd.f32 %v589_v57, %v577_v58 }
  0xcf   :  { %v603_v61 = vadd.f32 %v602_v54, %v590_v59 }
  0xd1   :  { %v606_v62 = vmax.f32 %v603_v61, 0.0 }
  0xd2   :  { %v578_v63 = vpop.f32.mrf.mxu0 }
  0xd3   :  { %v591_v0 = vpop.f32.mrf.mxu1  ;;  %v607_v1 = vpack.c.bf16 %v606_v62, %v606_v62 }
  0xd5   :  { %684 = vmatmul.bf16.vlgmr.msrb.gmra.mxu3 %v607_v1 }
 0x158   :  { %v685_v3 = vpop.f32.mrf.mxu3 }
 0x159   :  { %v686_v4 = vadd.f32 %v994_v2, %v685_v3 }
 0x15b   :  { %v689_v5 = vsub.f32 0.0, %v686_v4 }
 0x15d   :  { %v690_v6 = vmul.f32 1.442695, %v689_v5 }
 0x15f   :  { %1023 = vpow2.f32 %v690_v6 }
 0x160   :  { %v687_v7 = vpop.f32.mrf.mxu3 }
 0x165   :  { %v1024_v8 = vpop.eup %1023 }
 0x166   :  { %v692_v9 = vadd.f32 1.0, %v1024_v8 }
 0x168   :  { %1025 = vrcp.f32 %v692_v9 }
 0x16e   :  { %v1026_v10 = vpop.eup %1025 }
 0x16f   :  { %v694_v11 = vpack.c.bf16 %v1026_v10, %v1026_v10 }
 0x171   :  { %695 = vst [vmem:[%s1161_s5] sm:$0xf] %v694_v11 }
 0x172   :  { %700 = vsyncpa [#allocation3], 1 }
 0x173   :  { %701 = vsyncpa [#allocation5], 1 }

</bundles_post_ra>
